<compile_context>
chip_gen: v5e
topology: v5e:2x2
jax: 0.10.0
libtpu: 0.0.40
codegen_flags: <defaults>
</compile_context>

<pallas_src>
import jax
import jax.numpy as jnp
from jax.experimental import pallas as pl
from jax.experimental.pallas import tpu as pltpu

N_CLASSES = 1000
EMBED_DIM = 128     # multiple of 128 -> lane-dense output stores
BATCH = 8
UCG_RATE = 0.1


def gather_kernel(ids_ref, emb_row_ref, out_ref):
    # ids_ref (SMEM scalar prefetch) already steered the index_map; the body
    # is a plain VMEM copy of the gathered row into the output block.
    del ids_ref
    out_ref[...] = emb_row_ref[...]


def class_embedder_forward(batch, emb_table, rng_key=None, *, key='class',
                           ucg_rate=UCG_RATE, disable_dropout=False):
    """Equivalent of ClassEmbedder.forward. Returns (B, 1, embed_dim)."""
    # TODO(synk): the dict lookup batch[key] and the string `key` argument are
    # host-side Python; only the numeric path runs on device.
    class_ids = jnp.asarray(batch[key]).astype(jnp.int32).reshape(-1)   # (B,)
    b = class_ids.shape[0]
    n_classes, d = emb_table.shape

    apply_ucg = (float(ucg_rate) > 0.0) and (not disable_dropout)
    if apply_ucg:
        if rng_key is None:
            raise ValueError("rng_key is required when ucg_rate > 0 and "
                             "dropout is enabled")
        # torch.bernoulli(ucg_rate) -> replace id with the unconditional class.
        drop = jax.random.bernoulli(rng_key, float(ucg_rate), (b,))
        class_ids = jnp.where(drop, jnp.int32(n_classes - 1), class_ids)

    # View the table as (n_classes, 1, D) so the gathered block (1, 1, D) has
    # tile-legal trailing dims (second-to-last == full dim, last == 128*k).
    emb3 = emb_table.reshape(n_classes, 1, d)

    out = pl.pallas_call(
        gather_kernel,
        out_shape=jax.ShapeDtypeStruct((b, 1, d), emb_table.dtype),
        grid_spec=pltpu.PrefetchScalarGridSpec(
            num_scalar_prefetch=1,          # class ids -> SMEM, fed to index_maps
            grid=(b,),
            in_specs=[pl.BlockSpec((1, 1, d),
                                   lambda i, ids: (ids[i], 0, 0))],
            out_specs=pl.BlockSpec((1, 1, d),
                                   lambda i, ids: (i, 0, 0)),
        ),
        compiler_params=pltpu.CompilerParams(
            dimension_semantics=("arbitrary",)),
    )(class_ids, emb3)
    return out                                              # (B, 1, D)


if __name__ == "__main__":
    root = jax.random.PRNGKey(0)
    k_emb, k_ids, k_drop = jax.random.split(root, 3)
    emb_table = jax.random.normal(k_emb, (N_CLASSES, EMBED_DIM),
                                  jnp.float32) * 0.02
    class_ids = jax.random.randint(k_ids, (BATCH,), 0, N_CLASSES,
                                   dtype=jnp.int32)
    batch = {'class': class_ids}

    # Default forward path (UCG dropout active).
    z = class_embedder_forward(batch, emb_table, k_drop, ucg_rate=UCG_RATE)
    jax.block_until_ready(z)
    assert z.shape == (BATCH, 1, EMBED_DIM)
    assert bool(jnp.all(jnp.isfinite(z)))

    # Every row must be either its class embedding or the "unconditional"
    # (n_classes - 1) embedding.
    keep = emb_table[class_ids]                    # (B, D)
    drop = emb_table[N_CLASSES - 1][None, :]       # (1, D)
    row = z[:, 0, :]
    is_keep = jnp.all(jnp.abs(row - keep) < 1e-6, axis=-1)
    is_drop = jnp.all(jnp.abs(row - drop) < 1e-6, axis=-1)
    assert bool(jnp.all(is_keep | is_drop))

    # disable_dropout=True must reproduce a plain embedding lookup.
    z_nd = class_embedder_forward(batch, emb_table, k_drop,
                                  ucg_rate=UCG_RATE, disable_dropout=True)
    jax.block_until_ready(z_nd)
    assert bool(jnp.allclose(z_nd[:, 0, :], keep))

    print("KERNEL_OK")
</pallas_src>

<mosaic_0001>
module attributes {stable_mosaic.version = 11 : i64} {
  func.func @gather_kernel(%arg0: i32, %arg1: memref<8xi32, #tpu.memory_space<smem>>, %arg2: memref<1x1x128xf32, #tpu.memory_space<vmem>>, %arg3: memref<1x1x128xf32, #tpu.memory_space<vmem>>) attributes {dimension_semantics = [#tpu.dimension_semantics<arbitrary>], iteration_bounds = array<i64: 8>, scalar_prefetch = 1 : i64, scratch_operands = 0 : i64, tpu.core_type = #tpu.core_type<tc>, window_params = [{transform_indices = @transform_0, window_bounds = array<i64: 1, 1, 128>}, {transform_indices = @transform_1, window_bounds = array<i64: 1, 1, 128>}]} {
    %c0 = arith.constant 0 : index
    %c0_0 = arith.constant 0 : index
    %c0_1 = arith.constant 0 : index
    %0 = vector.load %arg2[%c0, %c0_0, %c0_1] : memref<1x1x128xf32, #tpu.memory_space<vmem>>, vector<1x1x128xf32>
    %c0_2 = arith.constant 0 : index
    %c0_3 = arith.constant 0 : index
    %c0_4 = arith.constant 0 : index
    %1 = vector.load %arg3[%c0_2, %c0_3, %c0_4] : memref<1x1x128xf32, #tpu.memory_space<vmem>>, vector<1x1x128xf32>
    tpu.vector_store %arg3[%c0_2, %c0_3, %c0_4], %0 {strides = array<i32>} : memref<1x1x128xf32, #tpu.memory_space<vmem>>, vector<1x1x128xf32>,
    return
  }
  func.func @transform_0(%arg0: i32, %arg1: memref<8xi32, #tpu.memory_space<smem>>) -> (i32, i32, i32) {
    %0 = arith.index_cast %arg0 : i32 to index
    %1 = memref.load %arg1[%0] : memref<8xi32, #tpu.memory_space<smem>>
    %c0_i32 = arith.constant 0 : i32
    %c0_i32_0 = arith.constant 0 : i32
    %c0_i32_1 = arith.constant 0 : i32
    return %1, %c0_i32, %c0_i32_0 : i32, i32, i32
  }
  func.func @transform_1(%arg0: i32, %arg1: memref<8xi32, #tpu.memory_space<smem>>) -> (i32, i32, i32) {
    %c0_i32 = arith.constant 0 : i32
    %c0_i32_0 = arith.constant 0 : i32
    %c0_i32_1 = arith.constant 0 : i32
    return %arg0, %c0_i32, %c0_i32_0 : i32, i32, i32
  }
}

</mosaic_0001>

<bundles_post_ra>
// kernel: tpu_custom_call.1
= control target key start
LH: loop header
LB: loop body
LE: loop exit
PB: predicated region body
PF: predicated region fallthrough
CT: control target
= control target key end

     0   :  { %s436_s12 = smov [#allocation3]   ;;  %s613_s0 = inlined_call_operand.hbm [shape: s32[8], index: 0, kind: input, shape index: {}]   ;;  %s614_s1 = inlined_call_operand.hbm [shape: f32[1000,1,128], index: 1, kind: input, shape index: {}]   ;;  %s615_s2 = inlined_call_operand.hbm [shape: f32[8,1,128], index: 2, kind: output, shape index: {}]  }
   0x1   :  { %s8_s11 = sshll.u32 %s613_s0, 4  ;;  %s9_s11 = int_to_ptr.hbm [resolvable:$true] %s8_s11 }
   0x2   :  { %11 = dma.hbm_to_smem %s9_s11, 16, %s436_s12, [#allocation2] }
   0x3   :  { %398 = dma.done.wait [#allocation2], 16 }
   0x4   :  { %399 = vsyncadd [#allocation2], 4294967280 }
   0x5   :  { %14 = sfence }
   0x6   :  { %15 = vsyncpa [#allocation5], 0 }
   0x7   :  { %17 = vsyncpa [#allocation5 + $0x1], 0 }
   0x8   :  { %18 = vsyncpa [#allocation6], 0 }
   0x9   :  { %20 = vsyncpa [#allocation6 + $0x1], 0  ;;  %s455_s13 = smov 0   ;;  %s457_s14 = smov 0  }
   0xa   :  { %s459_s15 = smov 0   ;;  %s461_s16 = smov 0  }
   0xb   :  { %s463_s17 = smov 0   ;;  %s465_s0 = smov 0  }
   0xc   :  { %s467_s18 = smov 0  }
   0xd LB: > { %s489_s19 = sadd.s32 4294967295, %s434_s18   ;;  %s219_s20 = sadd.s32 4294967294, %s434_s18   ;;  %s434_s18 = sphi %s467_s18, %s630_s18   ;;  %s430_s0 = sphi %s465_s0, %s629_s0   ;;  %s426_s17 = sphi %s463_s17, %s628_s17   ;;  %s422_s16 = sphi %s461_s16, %s627_s16   ;;  %s418_s15 = sphi %s459_s15, %s626_s15   ;;  %s414_s14 = sphi %s457_s14, %s625_s14   ;;  %s410_s13 = sphi %s455_s13, %s624_s13  }
   0xe   : > { %s493_s21 = sadd.s32 1, %s434_s18   ;;  %s30_s22 = sld [smem:[#allocation3 + %s434_s18]] }
   0xf   : > { %s31_s23 = sld [smem:[#allocation3 + %s493_s21]]  ;;  %s35_s24 = sadd.s32 1, %s430_s0 }
  0x10   : > { %p42_p0 = scmp.ne.s32.totalorder %s430_s0, %s426_s17  ;;  %p43_p1 = scmp.eq.s32.totalorder %s434_s18, 0 }
  0x11   : > { %p48_p2 = scmp.ne.s32.totalorder %s426_s17, %s422_s16  ;;  %p49_p3 = scmp.eq.s32.totalorder %s489_s19, 0 }
  0x12   : > { %p503_p4 = por %p43_p1, %p42_p0  ;;  %s58_s26 = ssub.s32 %s434_s18, %s493_s21 }
  0x13   : > { %p509_p5 = por %p49_p3, %p48_p2  ;;  %p59_p6 = scmp.eq.s32.totalorder %s58_s26, 0 }
  0x14   : > { %s61_s28 = sadd.s32 1, %s418_s15  ;;  %p71_p7 = scmp.ne.s32.totalorder %s418_s15, %s414_s14 }
  0x15   : > { %s32_s29 = ssub.s32 %s30_s22, %s31_s23  ;;  %p72_p8 = scmp.eq.s32.totalorder %s489_s19, 7 }
  0x16   : > { %p33_p9 = scmp.eq.s32.totalorder %s32_s29, 0  ;;  %p77_p10 = scmp.ne.s32.totalorder %s414_s14, %s410_s13 }
  0x17   : > { %s520_s30 = scalar_select %p59_p6, %s418_s15, %s61_s28  }
  0x18   : > { %s523_s3 = scalar_select %p33_p9, %s430_s0, %s35_s24  }
  0x19   : > { %p525_p11 = por %p72_p8, %p71_p7  ;;  %p78_p12 = scmp.eq.s32.totalorder %s219_s20, 7 }
  0x1a   : > { %618 = sst [smem:[#allocation13_spill]] %s523_s3  ;;  %p241_p0 = scmp.lt.s32.totalorder %s434_s18, 8 }
  0x1b   : > { %p529_p13 = por %p78_p12, %p77_p10  ;;  %s98_s6 = sand.u32 1, %s430_s0  }
  0x1c   : > { %s225_s7 = scalar_select %p503_p4, [#allocation3], [#allocation8] }
  0x1d   : > { %s226_s8 = scalar_select %p503_p4, %s434_s18, 0 }
  0x1e   : > { %s632_s7 = smov (!%p241_p0, %s225_s7), [#allocation9]  ;;  %p542_p1 = pnand %p241_p0, %p503_p4 }
  0x1f   : > { %s634_s8 = smov (!%p241_p0, %s226_s8), 0  ;;  %p222_p2 = scmp.ge.s32.totalorder %s434_s18, 1 }
  0x20   : > { %s102_s10 = sld [smem:[%s632_s7 + %s634_s8]]  ;;  %p114_p3 = scmp.lt.s32.totalorder %s434_s18, 9 }
  0x21   : > { %s101_s11 = scalar_lea.vmem [#allocation4], %s98_s6  ;;  %s99_s25 = scalar_lea.sflag [#allocation5], %s98_s6 }
  0x22   : > { %s109_s12 = sshll.u32 %s101_s11, 4  ;;  %p548_p6 = pnand %p222_p2, %p114_p3  ;;  %s110_s12 = int_to_ptr.vmem [resolvable:$true] %s109_s12 }
  0x23   : > { %p316_p7 = pneg %p542_p1  ;;  %s319_s8 = scalar_lea.hbm %s614_s1, 1000 }
  0x26   : > { %s105_s23 = scalar_lea.hbm %s614_s1, %s102_s10 }
  0x27   : > { %s107_s24 = sshll.u32 %s105_s23, 4  ;;  %s108_s24 = int_to_ptr.hbm [resolvable:$true] %s107_s24 }
  0x28   : > { %s312_s26 = sshra.s32 %s108_s24, 4  ;;  %s313_s26 = int_to_ptr.hbm [resolvable:$true] %s312_s26 }
  0x29   : > { %s314_s28 = scalar_lea.hbm %s313_s26, 1  ;;  %p320_p10 = scmp.lt.s32.totalorder %s313_s26, %s614_s1 }
  0x2a   : > { %p315_p4 = scmp.ne.s32.totalorder %s313_s26, %s314_s28  ;;  %p321_p12 = scmp.lt.s32.totalorder %s319_s8, %s314_s28 }
  0x2c   : > { %p317_p8 = pnand %p316_p7, %p315_p4  ;;  %p322_p0 = por %p321_p12, %p320_p10 }
  0x2e   : > { %p318_p9 = pneg %p317_p8 }
  0x30   : > { %p323_p2 = pnand %p322_p0, %p318_p9 }
  0x32   : > { %326 = shalt.err (!%p323_p2)
}
  0x33   : > { %236 = dma.hbm_to_vmem [thread:$0]  (!%p542_p1), %s108_s24, 16, %s110_s12, %s99_s25  }
  0x34   : > { %118 = sbr.rel (%p548_p6) target bundleno = 73 (0x49), region = 24  ;;  %s120_s6 = sand.u32 (!%p548_p6), 1, %s426_s17  }
  0x35   : > { %s121_s10 = scalar_lea.sflag (!%p548_p6), [#allocation5], %s120_s6  ;;  %s123_s20 = scalar_lea.vmem (!%p548_p6), [#allocation4], %s120_s6 }
  0x39   : > { %401 = dma.done.wait (%p509_p5), %s121_s10, 16  }
  0x3a   : > { %403 = vsyncadd (%p509_p5), %s121_s10, 4294967280  ;;  %s139_s3 = sand.u32 1, %s414_s14   ;;  %s153_s12 = scalar_lea.hbm %s615_s2, %s489_s19  ;;  %v142_v0 = vld [vmem:[%s123_s20] sm:$0x1] }
  0x3b   : > { %s140_s16 = scalar_lea.vmem [#allocation7], %s139_s3  ;;  %s157_s24 = sshll.u32 %s153_s12, 4  ;;  %s158_s24 = int_to_ptr.hbm [resolvable:$true] %s157_s24 }
  0x3c   : > { %s155_s23 = sshll.u32 %s140_s16, 4  ;;  %143 = vst [vmem:[%s140_s16] sm:$0x1] %v142_v0  ;;  %s145_s25 = scalar_lea.sflag [#allocation6], %s139_s3  ;;  %s156_s23 = int_to_ptr.vmem [resolvable:$true] %s155_s23 }
  0x3d   : > { %s356_s26 = sshra.s32 %s158_s24, 4  ;;  %s362_s7 = scalar_lea.hbm %s615_s2, 8  ;;  %s357_s26 = int_to_ptr.hbm [resolvable:$true] %s356_s26 }
  0x3e   : > { %s358_s27 = scalar_lea.hbm %s357_s26, 1  ;;  %p363_p6 = scmp.lt.s32.totalorder %s357_s26, %s615_s2 }
  0x3f   : > { %p359_p5 = scmp.ne.s32.totalorder %s357_s26, %s358_s27  ;;  %p364_p4 = scmp.lt.s32.totalorder %s362_s7, %s358_s27 }
  0x41   : > { %p360_p1 = pnand %p359_p5, %p525_p11  ;;  %p365_p7 = por %p364_p4, %p363_p6 }
  0x43   : > { %p361_p3 = pneg %p360_p1 }
  0x45   : > { %p366_p8 = pnand %p365_p7, %p361_p3 }
  0x47   : > { %369 = shalt.err (!%p366_p8)
}
  0x48   : > { %229 = dma.vmem_to_hbm [thread:$0]  (%p525_p11), %s156_s23, 16, %s158_s24, %s145_s25  }
  0x49 PF: > { %p242_p9 = scmp.ge.s32.totalorder %s434_s18, 2  ;;  %s169_s11 = sand.u32 1, %s410_s13  }
  0x4a   : > { %s170_s6 = scalar_lea.sflag [#allocation6], %s169_s11 }
  0x4b   : > { %p238_p10 = pnand %p242_p9, %p529_p13 }
  0x4d   : > { %p239_p12 = pneg %p238_p10 }
  0x4f   : > { %405 = dma.done.wait (%p239_p12), %s170_s6, 16  }
  0x50   : > { %407 = vsyncadd (%p239_p12), %s170_s6, 4294967280  ;;  %s623_s4 = sld [smem:[#allocation13_spill]]  ;;  %p23_p11 = scmp.ge.s32.totalorder %s493_s21, 10  }
  0x51   : > { %s624_s13 = smov %s414_s14  ;;  %s625_s14 = smov %s418_s15 }
  0x52   : > { %s626_s15 = smov %s520_s30  ;;  %s627_s16 = smov %s426_s17 }
  0x53   : > { %s628_s17 = smov %s430_s0  ;;  %s630_s18 = smov %s493_s21 }
  0x54   :  { %25 = sbr.rel (!%p23_p11) target bundleno = 13 (0xd), region = 69 }
  0x56   : > { %s629_s0 = smov %s623_s4 }
  0x59   :  { %175 = vsyncpa [#allocation5], 1 }
  0x5a   :  { %177 = vsyncpa [#allocation5 + $0x1], 1 }
  0x5b   :  { %178 = vsyncpa [#allocation6], 1 }
  0x5c   :  { %180 = vsyncpa [#allocation6 + $0x1], 1 }

</bundles_post_ra>
